<compile_context>
chip_gen: v7x
topology: tpu7x:2x2x1
jax: 0.10.0
libtpu: 0.0.40
codegen_flags: <defaults>
</compile_context>

<pallas_src>
import functools

import jax
import jax.numpy as jnp
from jax.experimental import pallas as pl
from jax.experimental.pallas import tpu as pltpu


def _round_up(x, m):
    return (x + m - 1) // m * m


def _vmem_capacity_bytes():
    """Physical per-core VMEM; conservative 64 MiB (v7x) fallback."""
    try:
        v = int(pltpu.get_tpu_info().vmem_capacity_bytes)
        if v > 0:
            return v
    except Exception:
        pass
    return 64 << 20


def _num_tensorcores_per_chip():
    """Best-effort TC-per-chip query (v7x=2); defaults to 1 if unknown."""
    try:
        info = pltpu.get_tpu_info()
        for name in ("num_cores", "core_count", "tensorcores_per_chip",
                     "num_tensor_cores"):
            v = getattr(info, name, None)
            if isinstance(v, int) and v > 0:
                return v
    except Exception:
        pass
    try:
        v = getattr(jax.devices()[0], "num_cores", None)
        if isinstance(v, int) and v > 0:
            return v
    except Exception:
        pass
    return 1


def _tile_bytes(bt, *, Ls, Kb, L, num_cls, Dp, in_itemsize, out_itemsize):
    """VMEM bytes for one batch tile: double-buffered blocks + kernel temporaries."""
    inp = 2 * bt * Ls * Kb * in_itemsize                 # double-buffered input block
    out = 2 * (L + num_cls) * bt * Dp * out_itemsize     # double-buffered output block
    tmp = (bt * Ls * Kb * (in_itemsize + 2)              # masked copy + bf16 cast of x
           + bt * Ls * Dp * 4                            # f32 matmul accumulator slab
           + (L + num_cls) * bt * Dp * 4)                # transposed / broadcast slab
    const = Kb * Dp * 2 + (1 + L + num_cls) * Dp * 4     # resident params (1-buffered)
    return inp + out + tmp + const


def _pick_batch_tile(B, *, budget_bytes, tile_bytes_fn, prefer_multi_step):
    """Largest sublane-legal divisor of B whose tile fits the VMEM byte budget.

    Bt must be a multiple of 8 (or == B) because batch is the output sublane
    dim after the fused transpose.  On multi-TensorCore chips (v7x) we prefer
    >= 2 grid steps so the "parallel" grid axis shards across both cores.
    """
    candidates = [bt for bt in range(1, B + 1)
                  if B % bt == 0 and (bt == B or bt % 8 == 0)]
    feasible = [bt for bt in candidates if tile_bytes_fn(bt) <= budget_bytes]
    if not feasible:
        feasible = [min(candidates)]        # smallest legal tile; vmem_limit stretches
    bt = max(feasible)
    if prefer_multi_step and bt == B:
        smaller = [c for c in feasible if c < B]
        if smaller:
            bt = max(smaller)
    return bt


def _embed_kernel(x_ref, w_ref, b_ref, pos_ref, cls_ref, o_ref, *, L, F_in):
    """One batch tile of: Linear + ReLU + positional add + cls append + transpose.

    x_ref:   (Bt, Ls, Kb)             raw input slab (Ls >= L rows, Kb >= F_in cols)
    w_ref:   (Kb, Dp)                 projection weight, zero-padded in K/N, bf16
    b_ref:   (1, Dp)                  projection bias (f32, zero-padded in N)
    pos_ref: (L, Dp)                  positional embedding repeat_interleave'd
    cls_ref: (num_cls, Dp)            verb/noun (or action) embeddings + positions
    o_ref:   (L+num_cls, Bt, Dp)      output, already seq-major (transpose fused)
    """
    Bt, Ls, Kb = x_ref.shape
    Dp = w_ref.shape[1]
    num_cls = cls_ref.shape[0]

    # Fold batch into the matmul M dimension: one MXU matmul per grid step.
    x = x_ref[...].reshape(Bt * Ls, Kb)
    if Kb > F_in:
        # Zero the unused feature columns: they may hold Inf/NaN garbage and
        # 0-weight * Inf would still poison the row.
        col = jax.lax.broadcasted_iota(jnp.int32, (Bt * Ls, Kb), 1)
        x = jnp.where(col < F_in, x, 0.0)
    x = x.astype(w_ref.dtype)

    y = jnp.dot(x, w_ref[...], preferred_element_type=jnp.float32)   # (Bt*Ls, Dp)
    y = jnp.maximum(y + b_ref[...], 0.0)                             # bias + ReLU
    y = y.reshape(Bt, Ls, Dp)[:, :L, :] + pos_ref[...][None]         # + positional

    # Fused transpose: (Bt, L, Dp) -> (L, Bt, Dp); rides the XLU slot.
    o_ref[:L, :, :] = jnp.transpose(y, (1, 0, 2)).astype(o_ref.dtype)
    # cls-token rows are identical for every batch element in the tile.
    o_ref[L:, :, :] = jnp.broadcast_to(
        cls_ref[...][:, None, :], (num_cls, Bt, Dp)).astype(o_ref.dtype)


def init_params(key, seq_len, num_clips, visual_input_dim, d_model, embed_actions):
    num_cls = 1 if embed_actions else 2
    ks = jax.random.split(key, 5)
    bound = 1.0 / (visual_input_dim ** 0.5)  # PyTorch nn.Linear default init range
    params = {
        "w": jax.random.uniform(ks[0], (visual_input_dim, d_model),
                                jnp.float32, -bound, bound),
        "b": jax.random.uniform(ks[1], (d_model,), jnp.float32, -bound, bound),
        "pos": 0.001 * jax.random.normal(
            ks[2], (1, seq_len + num_cls, d_model), jnp.float32),
    }
    if embed_actions:
        params["action"] = 0.001 * jax.random.normal(ks[3], (1, 1, d_model), jnp.float32)
    else:
        params["verb"] = 0.001 * jax.random.normal(ks[3], (1, 1, d_model), jnp.float32)
        params["noun"] = 0.001 * jax.random.normal(ks[4], (1, 1, d_model), jnp.float32)
    return params


def prepare_feature_embedding_params(params, *, seq_len, num_clips, visual_input_dim,
                                     embed_actions, input_feature_dim,
                                     compute_dtype=jnp.bfloat16):
    """One-time parameter prep (cast/pad/repeat/concat), hoisted out of forward."""
    num_cls = 1 if embed_actions else 2
    L = seq_len * num_clips
    d_model = params["w"].shape[1]
    F_in = visual_input_dim
    F_total = input_feature_dim
    assert F_total >= F_in

    Dp = _round_up(d_model, 128)                    # lane-dense output / weight-N dim
    Kb = min(_round_up(F_in, 128), F_total)         # lane-legal K (DMA) width

    w = params["w"].astype(compute_dtype)                                # (F_in, d)
    w = jnp.pad(w, ((0, Kb - F_in), (0, Dp - d_model)))                  # (Kb, Dp)
    b = jnp.pad(params["b"].astype(jnp.float32), (0, Dp - d_model)).reshape(1, Dp)

    pos = params["pos"].astype(jnp.float32)          # (1, seq_len + num_cls, d)
    # positional_embedding[:, :-num_cls, :].repeat_interleave(num_clips, dim=1)
    pos_vis = jnp.repeat(pos[0, :seq_len, :], num_clips, axis=0)         # (L, d)
    pos_vis = jnp.pad(pos_vis, ((0, 0), (0, Dp - d_model)))              # (L, Dp)

    if embed_actions:
        cls = params["action"][0].astype(jnp.float32) + pos[0, -1, :][None, :]
    else:
        verb = params["verb"][0].astype(jnp.float32) + pos[0, -2, :][None, :]
        noun = params["noun"][0].astype(jnp.float32) + pos[0, -1, :][None, :]
        cls = jnp.concatenate([verb, noun], axis=0)                      # (num_cls, d)
    cls = jnp.pad(cls, ((0, 0), (0, Dp - d_model)))                      # (num_cls, Dp)

    return {
        "w": w, "b": b, "pos_vis": pos_vis, "cls": cls,
        "meta": dict(L=L, num_cls=num_cls, F_in=F_in, Kb=Kb,
                     d_model=d_model, Dp=Dp),
    }


def feature_embedding_forward(inputs, prepped, *, out_dtype=jnp.float32):
    """Returns (L + num_cls, B, d_model) -- the module's post-transpose layout.

    Pass out_dtype=jnp.bfloat16 when the downstream consumer is bf16 to halve
    the bytes of the largest array written.
    """
    meta = prepped["meta"]
    L, num_cls = meta["L"], meta["num_cls"]
    F_in, Kb = meta["F_in"], meta["Kb"]
    d_model, Dp = meta["d_model"], meta["Dp"]

    B, T, F_total = inputs.shape
    assert T >= L and F_total >= Kb >= F_in

    Ls = min(_round_up(L, 8), T)        # sublane-legal number of seq rows to DMA

    w, b, pos_vis, cls = prepped["w"], prepped["b"], prepped["pos_vis"], prepped["cls"]

    cap = _vmem_capacity_bytes()
    budget = min(int(cap * 0.55), 96 << 20)     # ~35 MiB on v7x, ~70 MiB on v5e/v6e
    in_isize = inputs.dtype.itemsize
    out_isize = jnp.dtype(out_dtype).itemsize
    tile_bytes = lambda bt: _tile_bytes(bt, Ls=Ls, Kb=Kb, L=L, num_cls=num_cls, Dp=Dp,
                                        in_itemsize=in_isize, out_itemsize=out_isize)
    Bt = _pick_batch_tile(B, budget_bytes=budget, tile_bytes_fn=tile_bytes,
                          prefer_multi_step=_num_tensorcores_per_chip() > 1)
    grid = (B // Bt,)

    vmem_limit = int(min(max(tile_bytes(Bt) + (8 << 20), 32 << 20), int(cap * 0.9)))

    kernel = functools.partial(_embed_kernel, L=L, F_in=F_in)

    def run(single_buffer_consts):
        def const_spec(shape):
            # Grid-invariant operands: single-buffering halves their VMEM cost.
            if single_buffer_consts:
                return pl.BlockSpec(shape, lambda i: (0,) * len(shape),
                                    pipeline_mode=pl.Buffered(1))
            return pl.BlockSpec(shape, lambda i: (0,) * len(shape))

        grid_spec = pltpu.PrefetchScalarGridSpec(
            num_scalar_prefetch=0,
            grid=grid,
            in_specs=[
                pl.BlockSpec((Bt, Ls, Kb), lambda i: (i, 0, 0)),    # input slab
                const_spec((Kb, Dp)),                               # weight (resident)
                const_spec((1, Dp)),                                # bias
                const_spec((L, Dp)),                                # positional
                const_spec((num_cls, Dp)),                          # cls tokens
            ],
            # Output already seq-major: the module's transpose(0, 1) is fused.
            out_specs=pl.BlockSpec((L + num_cls, Bt, Dp), lambda i: (0, i, 0)),
        )
        return pl.pallas_call(
            kernel,
            out_shape=jax.ShapeDtypeStruct((L + num_cls, B, Dp), out_dtype),
            grid_spec=grid_spec,
            compiler_params=pltpu.CompilerParams(
                dimension_semantics=("parallel",),
                vmem_limit_bytes=vmem_limit,
            ),
        )(inputs, w, b, pos_vis, cls)

    try:
        out = run(True)
    except Exception:
        out = run(False)        # fall back if pl.Buffered(1) is rejected by Mosaic

    # TODO(synk): dropout / dropout_v / dropout_a (p=0.5) are eval-mode identity here.

    if Dp != d_model:
        out = out[:, :, :d_model]   # no-op in production (d_model % 128 == 0)
    return out


if __name__ == "__main__":
    # Small, module-consistent shapes.
    seq_len = 8
    num_clips = 2
    visual_input_dim = 32
    d_model = 32
    embed_actions = False   # -> verb + noun embeddings (num_cls = 2)
    B = 2
    L = seq_len * num_clips

    key = jax.random.PRNGKey(0)
    k_param, k_in = jax.random.split(key)
    params = init_params(k_param, seq_len, num_clips, visual_input_dim,
                         d_model, embed_actions)

    # Input is allowed to be larger than the slice the module consumes.
    T = L + 4
    F_total = visual_input_dim + 16
    inputs = jax.random.normal(k_in, (B, T, F_total), jnp.float32)

    prepped = prepare_feature_embedding_params(
        params, seq_len=seq_len, num_clips=num_clips,
        visual_input_dim=visual_input_dim, embed_actions=embed_actions,
        input_feature_dim=F_total)

    out = feature_embedding_forward(inputs, prepped)
    out = jax.block_until_ready(out)

    expected_shape = (L + 2, B, d_model)
    assert out.shape == expected_shape, (out.shape, expected_shape)
    assert out.dtype == jnp.float32

    # Cross-check against a pure-JAX f32 reference (kernel matmul runs with bf16
    # operands and f32 accumulation, so use a bf16-appropriate tolerance).
    x = inputs[:, :L, :visual_input_dim]
    ref_vis = jnp.maximum(x @ params["w"] + params["b"], 0.0)
    ref_vis = ref_vis + jnp.repeat(params["pos"][0, :seq_len], num_clips, axis=0)[None]
    verb = params["verb"][0] + params["pos"][0, -2][None]
    noun = params["noun"][0] + params["pos"][0, -1][None]
    ref = jnp.concatenate(
        [ref_vis,
         jnp.broadcast_to(jnp.concatenate([verb, noun], 0)[None], (B, 2, d_model))],
        axis=1).transpose(1, 0, 2)
    max_err = float(jnp.abs(out - ref).max())
    assert jnp.allclose(out, ref, atol=5e-2, rtol=5e-2), max_err

    print("KERNEL_OK")
</pallas_src>

<mosaic_0001>
module attributes {stable_mosaic.version = 11 : i64} {
  func.func @_embed_kernel(%arg0: i32, %arg1: memref<2x16x48xf32, #tpu.memory_space<vmem>>, %arg2: memref<48x128xbf16, #tpu.memory_space<vmem>>, %arg3: memref<1x128xf32, #tpu.memory_space<vmem>>, %arg4: memref<16x128xf32, #tpu.memory_space<vmem>>, %arg5: memref<2x128xf32, #tpu.memory_space<vmem>>, %arg6: memref<18x2x128xf32, #tpu.memory_space<vmem>>) attributes {dimension_semantics = [#tpu.dimension_semantics<parallel>], iteration_bounds = array<i64: 1>, scalar_prefetch = 0 : i64, scratch_operands = 0 : i64, tpu.core_type = #tpu.core_type<tc>, window_params = [{transform_indices = @transform_0, window_bounds = array<i64: 2, 16, 48>}, {pipeline_mode = #tpu.pipeline_mode<synchronous>, transform_indices = @transform_1, window_bounds = array<i64: 48, 128>}, {pipeline_mode = #tpu.pipeline_mode<synchronous>, transform_indices = @transform_2, window_bounds = array<i64: 1, 128>}, {pipeline_mode = #tpu.pipeline_mode<synchronous>, transform_indices = @transform_3, window_bounds = array<i64: 16, 128>}, {pipeline_mode = #tpu.pipeline_mode<synchronous>, transform_indices = @transform_4, window_bounds = array<i64: 2, 128>}, {transform_indices = @transform_5, window_bounds = array<i64: 18, 2, 128>}]} {
    %c0 = arith.constant 0 : index
    %c0_0 = arith.constant 0 : index
    %c0_1 = arith.constant 0 : index
    %0 = vector.load %arg1[%c0, %c0_0, %c0_1] : memref<2x16x48xf32, #tpu.memory_space<vmem>>, vector<2x16x48xf32>
    %1 = vector.shape_cast %0 : vector<2x16x48xf32> to vector<32x48xf32>
    %2 = tpu.iota {dimensions = array<i32: 1>} : vector<32x48xi32>
    %c32_i32 = arith.constant 32 : i32
    %3 = vector.broadcast %c32_i32 : i32 to vector<32x48xi32>
    %4 = arith.cmpi slt, %2, %3 : vector<32x48xi32>
    %cst = arith.constant 0.000000e+00 : f32
    %5 = vector.broadcast %cst : f32 to vector<32x48xf32>
    %6 = arith.select %4, %1, %5 : vector<32x48xi1>, vector<32x48xf32>
    %7 = arith.truncf %6 : vector<32x48xf32> to vector<32x48xbf16>
    %c0_2 = arith.constant 0 : index
    %c0_3 = arith.constant 0 : index
    %8 = vector.load %arg2[%c0_2, %c0_3] : memref<48x128xbf16, #tpu.memory_space<vmem>>, vector<48x128xbf16>
    %cst_4 = arith.constant dense<0.000000e+00> : vector<32x128xf32>
    %9 = tpu.matmul %7, %8, %cst_4 {dimension_numbers = #tpu.dot_dimension_numbers<[1], [0], [0], [1], [0, 0, 1, 1], [], []>} : vector<32x48xbf16>, vector<48x128xbf16>, vector<32x128xf32> -> vector<32x128xf32>
    %c0_5 = arith.constant 0 : index
    %c0_6 = arith.constant 0 : index
    %10 = vector.load %arg3[%c0_5, %c0_6] : memref<1x128xf32, #tpu.memory_space<vmem>>, vector<1x128xf32>
    %11 = vector.broadcast %10 : vector<1x128xf32> to vector<32x128xf32>
    %12 = arith.addf %9, %11 : vector<32x128xf32>
    %cst_7 = arith.constant 0.000000e+00 : f32
    %13 = vector.broadcast %cst_7 : f32 to vector<32x128xf32>
    %14 = arith.maximumf %12, %13 : vector<32x128xf32>
    %15 = vector.shape_cast %14 : vector<32x128xf32> to vector<2x16x128xf32>
    %c0_8 = arith.constant 0 : index
    %c0_9 = arith.constant 0 : index
    %16 = vector.load %arg4[%c0_8, %c0_9] : memref<16x128xf32, #tpu.memory_space<vmem>>, vector<16x128xf32>
    %17 = vector.shape_cast %16 : vector<16x128xf32> to vector<1x16x128xf32>
    %18 = vector.broadcast %17 : vector<1x16x128xf32> to vector<2x16x128xf32>
    %19 = arith.addf %15, %18 : vector<2x16x128xf32>
    %20 = tpu.transpose %19, [1, 0, 2] : vector<2x16x128xf32> -> vector<16x2x128xf32>
    %c0_10 = arith.constant 0 : index
    %c0_11 = arith.constant 0 : index
    %c0_12 = arith.constant 0 : index
    %21 = vector.load %arg6[%c0_10, %c0_11, %c0_12] : memref<18x2x128xf32, #tpu.memory_space<vmem>>, vector<16x2x128xf32>
    tpu.vector_store %arg6[%c0_10, %c0_11, %c0_12], %20 {strides = array<i32>} : memref<18x2x128xf32, #tpu.memory_space<vmem>>, vector<16x2x128xf32>,
    %c0_13 = arith.constant 0 : index
    %c0_14 = arith.constant 0 : index
    %22 = vector.load %arg5[%c0_13, %c0_14] : memref<2x128xf32, #tpu.memory_space<vmem>>, vector<2x128xf32>
    %23 = vector.shape_cast %22 : vector<2x128xf32> to vector<2x1x128xf32>
    %24 = vector.shape_cast %23 : vector<2x1x128xf32> to vector<2x1x128xf32>
    %25 = vector.broadcast %24 : vector<2x1x128xf32> to vector<2x2x128xf32>
    %c16 = arith.constant 16 : index
    %c0_15 = arith.constant 0 : index
    %c0_16 = arith.constant 0 : index
    %26 = vector.load %arg6[%c16, %c0_15, %c0_16] : memref<18x2x128xf32, #tpu.memory_space<vmem>>, vector<2x2x128xf32>
    tpu.vector_store %arg6[%c16, %c0_15, %c0_16], %25 {strides = array<i32>} : memref<18x2x128xf32, #tpu.memory_space<vmem>>, vector<2x2x128xf32>,
    return
  }
  func.func @transform_0(%arg0: i32) -> (i32, i32, i32) {
    %c0_i32 = arith.constant 0 : i32
    %c0_i32_0 = arith.constant 0 : i32
    %c0_i32_1 = arith.constant 0 : i32
    return %arg0, %c0_i32, %c0_i32_0 : i32, i32, i32
  }
  func.func @transform_1(%arg0: i32) -> (i32, i32) {
    %c0_i32 = arith.constant 0 : i32
    %c0_i32_0 = arith.constant 0 : i32
    %c0_i32_1 = arith.constant 0 : i32
    return %c0_i32, %c0_i32_0 : i32, i32
  }
  func.func @transform_2(%arg0: i32) -> (i32, i32) {
    %c0_i32 = arith.constant 0 : i32
    %c0_i32_0 = arith.constant 0 : i32
    %c0_i32_1 = arith.constant 0 : i32
    return %c0_i32, %c0_i32_0 : i32, i32
  }
  func.func @transform_3(%arg0: i32) -> (i32, i32) {
    %c0_i32 = arith.constant 0 : i32
    %c0_i32_0 = arith.constant 0 : i32
    %c0_i32_1 = arith.constant 0 : i32
    return %c0_i32, %c0_i32_0 : i32, i32
  }
  func.func @transform_4(%arg0: i32) -> (i32, i32) {
    %c0_i32 = arith.constant 0 : i32
    %c0_i32_0 = arith.constant 0 : i32
    %c0_i32_1 = arith.constant 0 : i32
    return %c0_i32, %c0_i32_0 : i32, i32
  }
  func.func @transform_5(%arg0: i32) -> (i32, i32, i32) {
    %c0_i32 = arith.constant 0 : i32
    %c0_i32_0 = arith.constant 0 : i32
    %c0_i32_1 = arith.constant 0 : i32
    return %c0_i32, %arg0, %c0_i32_0 : i32, i32, i32
  }
}

module attributes {stable_mosaic.version = 11 : i64} {
  func.func @_embed_kernel(%arg0: i32, %arg1: memref<2x16x48xf32, #tpu.memory_space<vmem>>, %arg2: memref<48x128xbf16, #tpu.memory_space<vmem>>, %arg3: memref<1x128xf32, #tpu.memory_space<vmem>>, %arg4: memref<16x128xf32, #tpu.memory_space<vmem>>, %arg5: memref<2x128xf32, #tpu.memory_space<vmem>>, %arg6: memref<18x2x128xf32, #tpu.memory_space<vmem>>) attributes {dimension_semantics = [#tpu.dimension_semantics<parallel>], iteration_bounds = array<i64: 1>, scalar_prefetch = 0 : i64, scratch_operands = 0 : i64, tpu.core_type = #tpu.core_type<tc>, window_params = [{transform_indices = @transform_0, window_bounds = array<i64: 2, 16, 48>}, {pipeline_mode = #tpu.pipeline_mode<synchronous>, transform_indices = @transform_1, window_bounds = array<i64: 48, 128>}, {pipeline_mode = #tpu.pipeline_mode<synchronous>, transform_indices = @transform_2, window_bounds = array<i64: 1, 128>}, {pipeline_mode = #tpu.pipeline_mode<synchronous>, transform_indices = @transform_3, window_bounds = array<i64: 16, 128>}, {pipeline_mode = #tpu.pipeline_mode<synchronous>, transform_indices = @transform_4, window_bounds = array<i64: 2, 128>}, {transform_indices = @transform_5, window_bounds = array<i64: 18, 2, 128>}]} {
    %c0 = arith.constant 0 : index
    %c0_0 = arith.constant 0 : index
    %c0_1 = arith.constant 0 : index
    %0 = vector.load %arg1[%c0, %c0_0, %c0_1] : memref<2x16x48xf32, #tpu.memory_space<vmem>>, vector<2x16x48xf32>
    %1 = vector.shape_cast %0 : vector<2x16x48xf32> to vector<32x48xf32>
    %2 = tpu.iota {dimensions = array<i32: 1>} : vector<32x48xi32>
    %c32_i32 = arith.constant 32 : i32
    %3 = vector.broadcast %c32_i32 : i32 to vector<32x48xi32>
    %4 = arith.cmpi slt, %2, %3 : vector<32x48xi32>
    %cst = arith.constant 0.000000e+00 : f32
    %5 = vector.broadcast %cst : f32 to vector<32x48xf32>
    %6 = arith.select %4, %1, %5 : vector<32x48xi1>, vector<32x48xf32>
    %7 = arith.truncf %6 : vector<32x48xf32> to vector<32x48xbf16>
    %c0_2 = arith.constant 0 : index
    %c0_3 = arith.constant 0 : index
    %8 = vector.load %arg2[%c0_2, %c0_3] : memref<48x128xbf16, #tpu.memory_space<vmem>>, vector<48x128xbf16>
    %cst_4 = arith.constant dense<0.000000e+00> : vector<32x128xf32>
    %9 = tpu.matmul %7, %8, %cst_4 {dimension_numbers = #tpu.dot_dimension_numbers<[1], [0], [0], [1], [0, 0, 1, 1], [], []>} : vector<32x48xbf16>, vector<48x128xbf16>, vector<32x128xf32> -> vector<32x128xf32>
    %c0_5 = arith.constant 0 : index
    %c0_6 = arith.constant 0 : index
    %10 = vector.load %arg3[%c0_5, %c0_6] : memref<1x128xf32, #tpu.memory_space<vmem>>, vector<1x128xf32>
    %11 = vector.broadcast %10 : vector<1x128xf32> to vector<32x128xf32>
    %12 = arith.addf %9, %11 : vector<32x128xf32>
    %cst_7 = arith.constant 0.000000e+00 : f32
    %13 = vector.broadcast %cst_7 : f32 to vector<32x128xf32>
    %14 = arith.maximumf %12, %13 : vector<32x128xf32>
    %15 = vector.shape_cast %14 : vector<32x128xf32> to vector<2x16x128xf32>
    %c0_8 = arith.constant 0 : index
    %c0_9 = arith.constant 0 : index
    %16 = vector.load %arg4[%c0_8, %c0_9] : memref<16x128xf32, #tpu.memory_space<vmem>>, vector<16x128xf32>
    %17 = vector.shape_cast %16 : vector<16x128xf32> to vector<1x16x128xf32>
    %18 = vector.broadcast %17 : vector<1x16x128xf32> to vector<2x16x128xf32>
    %19 = arith.addf %15, %18 : vector<2x16x128xf32>
    %20 = tpu.transpose %19, [1, 0, 2] : vector<2x16x128xf32> -> vector<16x2x128xf32>
    %c0_10 = arith.constant 0 : index
    %c0_11 = arith.constant 0 : index
    %c0_12 = arith.constant 0 : index
    %21 = vector.load %arg6[%c0_10, %c0_11, %c0_12] : memref<18x2x128xf32, #tpu.memory_space<vmem>>, vector<16x2x128xf32>
    tpu.vector_store %arg6[%c0_10, %c0_11, %c0_12], %20 {strides = array<i32>} : memref<18x2x128xf32, #tpu.memory_space<vmem>>, vector<16x2x128xf32>,
    %c0_13 = arith.constant 0 : index
    %c0_14 = arith.constant 0 : index
    %22 = vector.load %arg5[%c0_13, %c0_14] : memref<2x128xf32, #tpu.memory_space<vmem>>, vector<2x128xf32>
    %23 = vector.shape_cast %22 : vector<2x128xf32> to vector<2x1x128xf32>
    %24 = vector.shape_cast %23 : vector<2x1x128xf32> to vector<2x1x128xf32>
    %25 = vector.broadcast %24 : vector<2x1x128xf32> to vector<2x2x128xf32>
    %c16 = arith.constant 16 : index
    %c0_15 = arith.constant 0 : index
    %c0_16 = arith.constant 0 : index
    %26 = vector.load %arg6[%c16, %c0_15, %c0_16] : memref<18x2x128xf32, #tpu.memory_space<vmem>>, vector<2x2x128xf32>
    tpu.vector_store %arg6[%c16, %c0_15, %c0_16], %25 {strides = array<i32>} : memref<18x2x128xf32, #tpu.memory_space<vmem>>, vector<2x2x128xf32>,
    return
  }
  func.func @transform_0(%arg0: i32) -> (i32, i32, i32) {
    %c0_i32 = arith.constant 0 : i32
    %c0_i32_0 = arith.constant 0 : i32
    %c0_i32_1 = arith.constant 0 : i32
    return %arg0, %c0_i32, %c0_i32_0 : i32, i32, i32
  }
  func.func @transform_1(%arg0: i32) -> (i32, i32) {
    %c0_i32 = arith.constant 0 : i32
    %c0_i32_0 = arith.constant 0 : i32
    %c0_i32_1 = arith.constant 0 : i32
    return %c0_i32, %c0_i32_0 : i32, i32
  }
  func.func @transform_2(%arg0: i32) -> (i32, i32) {
    %c0_i32 = arith.constant 0 : i32
    %c0_i32_0 = arith.constant 0 : i32
    %c0_i32_1 = arith.constant 0 : i32
    return %c0_i32, %c0_i32_0 : i32, i32
  }
  func.func @transform_3(%arg0: i32) -> (i32, i32) {
    %c0_i32 = arith.constant 0 : i32
    %c0_i32_0 = arith.constant 0 : i32
    %c0_i32_1 = arith.constant 0 : i32
    return %c0_i32, %c0_i32_0 : i32, i32
  }
  func.func @transform_4(%arg0: i32) -> (i32, i32) {
    %c0_i32 = arith.constant 0 : i32
    %c0_i32_0 = arith.constant 0 : i32
    %c0_i32_1 = arith.constant 0 : i32
    return %c0_i32, %c0_i32_0 : i32, i32
  }
  func.func @transform_5(%arg0: i32) -> (i32, i32, i32) {
    %c0_i32 = arith.constant 0 : i32
    %c0_i32_0 = arith.constant 0 : i32
    %c0_i32_1 = arith.constant 0 : i32
    return %c0_i32, %arg0, %c0_i32_0 : i32, i32, i32
  }
}

</mosaic_0001>

<bundles_post_ra>
// kernel: tpu_custom_call.1
= control target key start
LH: loop header
LB: loop body
LE: loop exit
PB: predicated region body
PF: predicated region fallthrough
CT: control target
= control target key end

     0   :  { %v72_v1 = vlaneseq  ;;  %vm112_vm0 = vcmask 392192   ;;  %v447_v12 = vmov 1966171168   ;;  %s531_s0 = inlined_call_operand.vmem [shape: f32[2,20,48], index: 0, kind: input, shape index: {}]   ;;  %s532_s1 = inlined_call_operand.vmem [shape: bf16[48,128], index: 1, kind: input, shape index: {}]   ;;  %s533_s2 = inlined_call_operand.vmem [shape: f32[1,128], index: 2, kind: input, shape index: {}]   ;;  %s534_s3 = inlined_call_operand.vmem [shape: f32[16,128], index: 3, kind: input, shape index: {}]   ;;  %s535_s4 = inlined_call_operand.vmem [shape: f32[2,128], index: 4, kind: input, shape index: {}]   ;;  %s536_s5 = inlined_call_operand.hbm [shape: f32[18,2,128], index: 5, kind: output, shape index: {}]  }
   0x1   :  { %v420_v0 = vld [vmem:[%s532_s1] sm:$0xff]   ;;  %v421_v2 = vld [vmem:[%s532_s1 + $0x8] sm:$0xff]   ;;  %v422_v6 = vld [vmem:[%s532_s1 + $0x10] sm:$0xff]   ;;  %v337_v13 = vunpack.c.l.s4 %v447_v12 }
   0x2   :  { %403 = vmatprep.subr.bf16.mxu0 %v420_v0  ;;  %v73_v3 = vand.u32 127, %v72_v1  ;;  %v46_v4 = vld [vmem:[%s531_s0] sm:$0xff]  ;;  %v48_v5 = vld [vmem:[%s531_s0 + $0x8] sm:$0xff]  ;;  %v50_v7 = vld [vmem:[%s531_s0 + $0x18] sm:$0xff]  ;;  %v183_v15 = vshrl.u32 %v72_v1, 7 }
   0x3   :  { %404 = vmatpush3.bf16.msra.mxu0 %v420_v0  ;;  %v52_v8 = vld [vmem:[%s531_s0 + $0x20] sm:$0xff] }
   0x4   :  { %405 = vmatprep.subr.bf16.mxu0 %v421_v2  ;;  %vm74_vm1 = vcmp.lt.s32.totalorder %v73_v3, 32  ;;  %v397_v11 = vld.sshfl [vmem:[%s535_s4] sm:$0x11 pattern:$0x75316420] }
   0x5   :  { %v75_v9 = vsel %vm74_vm1, %v46_v4, 0.0  ;;  %v76_v10 = vsel %vm74_vm1, %v48_v5, 0.0 }
   0x6   :  { %v79_v14 = vpack.c.bf16 %v76_v10, %v75_v9 }
   0x7   :  { %10 = vsyncpa [#allocation4], 0  ;;  %406 = vmatpush3.bf16.msra.mxu0 %v421_v2  ;;  %v335_v16 = vcombine.high %v397_v11, %v397_v11  ;;  %v338_v17 = vunpack.c.0.s8 %v337_v13  ;;  %v77_v18 = vsel %vm74_vm1, %v50_v7, 0.0  ;;  %v78_v19 = vsel %vm74_vm1, %v52_v8, 0.0  ;;  %v383_v29 = vld [vmem:[%s533_s2] ss:$0 sm:$0xff] }
   0x8   :  { %407 = vmatprep.subr.bf16.mxu0 %v422_v6  ;;  %409 = vmatprep.mubr.msk.bf16.mxu0 %vm112_vm0, %v79_v14  ;;  %v352_v21 = vsub.s32 0, %v183_v15  ;;  %v80_v22 = vpack.c.bf16 %v78_v19, %v77_v18  ;;  %v448_v27 = vmov 1983009808   ;;  %v449_v31 = vmov 1934713408   ;;  %v172_v36 = vld [vmem:[%s534_s3] sm:$0xff] }
   0x9   :  { %v341_v20 = vsub.s32 %v338_v17, %v183_v15  ;;  %v180_v28 = vunpack.c.l.s4 %v448_v27  ;;  %v211_v32 = vunpack.c.l.s4 %v449_v31  ;;  %v173_v45 = vld [vmem:[%s534_s3 + $0x8] sm:$0xff]  ;;  %v450_v51 = vmov 0.0   ;;  %s451_s3 = smov [#allocation3]  }
   0xa   :  { %s368_s11 = sshll.u32 %s451_s3, 4  ;;  %s369_s11 = int_to_ptr.vmem [resolvable:$true] %s368_s11 }
   0xb   :  { %408 = vmatpush3.bf16.msra.mxu0 %v422_v6  ;;  %v342_v23 = vrot.slane %v397_v11, %v341_v20  ;;  %v349_v24 = vrot.slane %v335_v16, %v341_v20  ;;  %v181_v30 = vunpack.c.0.s8 %v180_v28  ;;  %v212_v43 = vunpack.c.0.s8 %v211_v32  ;;  %s423_s12 = scalar_lea.vmem %s369_s11, 576  ;;  %p428_p1 = scmp.lt.s32.totalorder %s369_s11, %s369_s11 }
   0xc   :  { %p424_p0 = scmp.ne.s32.totalorder %s369_s11, %s423_s12  ;;  %p429_p2 = scmp.lt.s32.totalorder %s423_s12, %s423_s12 }
   0xd   :  { %v353_v25 = vrot.slane %v342_v23, %v352_v21  ;;  %v357_v26 = vrot.slane %v349_v24, %v352_v21  ;;  %v184_v39 = vsub.s32 %v181_v30, %v183_v15  ;;  %v215_v55 = vsub.s32 %v212_v43, %v183_v15 }
   0xe   :  { %410 = vmatmul.mubr.msk.bf16.vlgmr.msra.gmra.mrb[0].mxu0 %vm112_vm0, %v80_v22  ;;  %p430_p3 = por %p429_p2, %p428_p1 }
   0xf   :  { %361 = vst [vmem:[#allocation3 + $0x20] sm:$0x3] %v353_v25  ;;  %362 = vst [vmem:[#allocation3 + $0x22] sm:$0x3] %v357_v26 }
  0x10   :  { %p431_p4 = pnand %p430_p3, %p424_p0 }
  0xe1   :  { %v411_v33 = vpop.f32.mrb[0].mxu0 }
  0xe2   :  { %v162_v34 = vadd.f32 %v411_v33, %v383_v29  ;;  %v153_v35 = vpop.f32.mrb[1].mxu0 }
  0xe3   :  { %v154_v37 = vadd.f32 %v383_v29, %v153_v35  ;;  %v412_v38 = vpop.f32.mrb[2].mxu0 }
  0xe4   :  { %v170_v40 = vmax.f32 %v162_v34, 0.0  ;;  %v165_v41 = vadd.f32 %v412_v38, %v383_v29  ;;  %v156_v42 = vpop.f32.mrb[3].mxu0 }
  0xe5   :  { %v168_v44 = vmax.f32 %v154_v37, 0.0  ;;  %v157_v46 = vadd.f32 %v383_v29, %v156_v42 }
  0xe6   :  { %v176_v47 = vadd.f32 %v172_v36, %v170_v40  ;;  %v171_v48 = vmax.f32 %v165_v41, 0.0 }
  0xe7   :  { %v174_v49 = vadd.f32 %v172_v36, %v168_v44  ;;  %v169_v50 = vmax.f32 %v157_v46, 0.0 }
  0xe8   :  { %v193_v52 = vcombine.high %v176_v47, %v450_v51  ;;  %v200_v53 = vrot.slane %v176_v47, %v184_v39  ;;  %v177_v54 = vadd.f32 %v173_v45, %v171_v48 }
  0xe9   :  { %v178_v56 = vcombine.high %v174_v49, %v450_v51  ;;  %v185_v57 = vrot.slane %v174_v49, %v184_v39  ;;  %v175_v58 = vadd.f32 %v173_v45, %v169_v50 }
  0xea   :  { %v207_v59 = vrot.slane %v193_v52, %v184_v39  ;;  %v259_v60 = vcombine.high %v177_v54, %v450_v51  ;;  %v266_v61 = vrot.slane %v177_v54, %v184_v39 }
  0xeb   :  { %v192_v62 = vrot.slane %v178_v56, %v184_v39  ;;  %v208_v63 = vcombine.low %v185_v57, %v200_v53  ;;  %v209_v0 = vcombine.high %v185_v57, %v200_v53  ;;  %v244_v1 = vcombine.high %v175_v58, %v450_v51 }
  0xec   :  { %v273_v2 = vrot.slane %v259_v60, %v184_v39  ;;  %v251_v3 = vrot.slane %v175_v58, %v184_v39 }
  0xed   :  { %v216_v4 = vrot.slane %v208_v63, %v215_v55  ;;  %v223_v5 = vrot.slane %v209_v0, %v215_v55  ;;  %v224_v6 = vcombine.low %v192_v62, %v207_v59  ;;  %v225_v7 = vcombine.high %v192_v62, %v207_v59  ;;  %389 = vst.sshfl [vmem:[#allocation3] sm:$0x11 pattern:$0x73516240] %v208_v63 }
  0xee   :  { %390 = vst.sshfl [vmem:[#allocation3 + $0x4] sm:$0x11 pattern:$0x73516240] %v209_v0  ;;  %v258_v8 = vrot.slane %v244_v1, %v184_v39  ;;  %v274_v9 = vcombine.low %v251_v3, %v266_v61  ;;  %v275_v10 = vcombine.high %v251_v3, %v266_v61 }
  0xef   :  { %v232_v11 = vrot.slane %v224_v6, %v215_v55  ;;  %v239_v12 = vrot.slane %v225_v7, %v215_v55  ;;  %v240_v13 = vcombine.high %v216_v4, %v450_v51  ;;  %v241_v14 = vcombine.high %v223_v5, %v450_v51  ;;  %391 = vst.sshfl [vmem:[#allocation3 + $0x8] sm:$0x11 pattern:$0x73516240] %v224_v6 }
  0xf0   :  { %392 = vst.sshfl [vmem:[#allocation3 + $0xc] sm:$0x11 pattern:$0x73516240] %v225_v7  ;;  %v282_v15 = vrot.slane %v274_v9, %v215_v55  ;;  %v289_v16 = vrot.slane %v275_v10, %v215_v55  ;;  %v290_v17 = vcombine.low %v258_v8, %v273_v2  ;;  %v291_v18 = vcombine.high %v258_v8, %v273_v2 }
  0xf1   :  { %393 = vst.sshfl [vmem:[#allocation3 + $0x10] sm:$0x11 pattern:$0x73516240] %v274_v9  ;;  %v242_v19 = vcombine.high %v232_v11, %v450_v51  ;;  %v243_v20 = vcombine.high %v239_v12, %v450_v51  ;;  %311 = vst [vmem:[#allocation3 + $0x2] sm:$0x3] %v240_v13 }
  0xf2   :  { %394 = vst.sshfl [vmem:[#allocation3 + $0x14] sm:$0x11 pattern:$0x73516240] %v275_v10  ;;  %313 = vst [vmem:[#allocation3 + $0x6] sm:$0x3] %v241_v14  ;;  %v298_v21 = vrot.slane %v290_v17, %v215_v55  ;;  %v305_v22 = vrot.slane %v291_v18, %v215_v55  ;;  %v306_v23 = vcombine.high %v282_v15, %v450_v51 }
  0xf3   :  { %v307_v24 = vcombine.high %v289_v16, %v450_v51  ;;  %395 = vst.sshfl [vmem:[#allocation3 + $0x18] sm:$0x11 pattern:$0x73516240] %v290_v17  ;;  %315 = vst [vmem:[#allocation3 + $0xa] sm:$0x3] %v242_v19 }
  0xf4   :  { %396 = vst.sshfl [vmem:[#allocation3 + $0x1c] sm:$0x11 pattern:$0x73516240] %v291_v18  ;;  %317 = vst [vmem:[#allocation3 + $0xe] sm:$0x3] %v243_v20  ;;  %v308_v25 = vcombine.high %v298_v21, %v450_v51  ;;  %v309_v26 = vcombine.high %v305_v22, %v450_v51 }
  0xf5   :  { %319 = vst [vmem:[#allocation3 + $0x12] sm:$0x3] %v306_v23  ;;  %321 = vst [vmem:[#allocation3 + $0x16] sm:$0x3] %v307_v24 }
  0xf6   :  { %323 = vst [vmem:[#allocation3 + $0x1a] sm:$0x3] %v308_v25  ;;  %325 = vst [vmem:[#allocation3 + $0x1e] sm:$0x3] %v309_v26 }
  0xf7   :  { %434 = shalt.err (!%p431_p4)
}
  0xf8   :  { %s435_s15 = scalar_lea.hbm %s536_s5, 576 }
  0xf9   :  { %p436_p5 = scmp.ne.s32.totalorder %s536_s5, %s435_s15  ;;  %p439_p6 = scmp.lt.u32.totalorder %s435_s15, %s536_s5 }
  0xfb   :  { %p441_p7 = pnand %p439_p6, %p436_p5 }
  0xfd   :  { %444 = shalt.err (!%p441_p7)
}
  0xfe   :  { %s452_s20 = smov 32   ;;  %s453_s21 = smov 2  }
  0xff   :  { %374 = dma.vmem_to_hbm [thread:$0]  %s369_s11, 576, %s536_s5, [#allocation4], %s452_s20, %s452_s20, %s453_s21  }
 0x100   :  { %445 = dma.done.wait [#allocation4], 576  }
 0x101   :  { %446 = vsyncadd [#allocation4], 4294966720 }
 0x102   :  { %378 = vsyncpa [#allocation4], 1 }

// kernel: tpu_custom_call.1
= control target key start
LH: loop header
LB: loop body
LE: loop exit
PB: predicated region body
PF: predicated region fallthrough
CT: control target
= control target key end

     0   :  { %v72_v1 = vlaneseq  ;;  %vm112_vm0 = vcmask 392192   ;;  %v447_v12 = vmov 1966171168   ;;  %s531_s0 = inlined_call_operand.vmem [shape: f32[2,20,48], index: 0, kind: input, shape index: {}]   ;;  %s532_s1 = inlined_call_operand.vmem [shape: bf16[48,128], index: 1, kind: input, shape index: {}]   ;;  %s533_s2 = inlined_call_operand.vmem [shape: f32[1,128], index: 2, kind: input, shape index: {}]   ;;  %s534_s3 = inlined_call_operand.vmem [shape: f32[16,128], index: 3, kind: input, shape index: {}]   ;;  %s535_s4 = inlined_call_operand.vmem [shape: f32[2,128], index: 4, kind: input, shape index: {}]   ;;  %s536_s5 = inlined_call_operand.hbm [shape: f32[18,2,128], index: 5, kind: output, shape index: {}]  }
   0x1   :  { %v420_v0 = vld [vmem:[%s532_s1] sm:$0xff]   ;;  %v421_v2 = vld [vmem:[%s532_s1 + $0x8] sm:$0xff]   ;;  %v422_v6 = vld [vmem:[%s532_s1 + $0x10] sm:$0xff]   ;;  %v337_v13 = vunpack.c.l.s4 %v447_v12 }
   0x2   :  { %403 = vmatprep.subr.bf16.mxu0 %v420_v0  ;;  %v73_v3 = vand.u32 127, %v72_v1  ;;  %v46_v4 = vld [vmem:[%s531_s0] sm:$0xff]  ;;  %v48_v5 = vld [vmem:[%s531_s0 + $0x8] sm:$0xff]  ;;  %v50_v7 = vld [vmem:[%s531_s0 + $0x18] sm:$0xff]  ;;  %v183_v15 = vshrl.u32 %v72_v1, 7 }
   0x3   :  { %404 = vmatpush3.bf16.msra.mxu0 %v420_v0  ;;  %v52_v8 = vld [vmem:[%s531_s0 + $0x20] sm:$0xff] }
   0x4   :  { %405 = vmatprep.subr.bf16.mxu0 %v421_v2  ;;  %vm74_vm1 = vcmp.lt.s32.totalorder %v73_v3, 32  ;;  %v397_v11 = vld.sshfl [vmem:[%s535_s4] sm:$0x11 pattern:$0x75316420] }
   0x5   :  { %v75_v9 = vsel %vm74_vm1, %v46_v4, 0.0  ;;  %v76_v10 = vsel %vm74_vm1, %v48_v5, 0.0 }
   0x6   :  { %v79_v14 = vpack.c.bf16 %v76_v10, %v75_v9 }
   0x7   :  { %10 = vsyncpa [#allocation4], 0  ;;  %406 = vmatpush3.bf16.msra.mxu0 %v421_v2  ;;  %v335_v16 = vcombine.high %v397_v11, %v397_v11  ;;  %v338_v17 = vunpack.c.0.s8 %v337_v13  ;;  %v77_v18 = vsel %vm74_vm1, %v50_v7, 0.0  ;;  %v78_v19 = vsel %vm74_vm1, %v52_v8, 0.0  ;;  %v383_v29 = vld [vmem:[%s533_s2] ss:$0 sm:$0xff] }
   0x8   :  { %407 = vmatprep.subr.bf16.mxu0 %v422_v6  ;;  %409 = vmatprep.mubr.msk.bf16.mxu0 %vm112_vm0, %v79_v14  ;;  %v352_v21 = vsub.s32 0, %v183_v15  ;;  %v80_v22 = vpack.c.bf16 %v78_v19, %v77_v18  ;;  %v448_v27 = vmov 1983009808   ;;  %v449_v31 = vmov 1934713408   ;;  %v172_v36 = vld [vmem:[%s534_s3] sm:$0xff] }
   0x9   :  { %v341_v20 = vsub.s32 %v338_v17, %v183_v15  ;;  %v180_v28 = vunpack.c.l.s4 %v448_v27  ;;  %v211_v32 = vunpack.c.l.s4 %v449_v31  ;;  %v173_v45 = vld [vmem:[%s534_s3 + $0x8] sm:$0xff]  ;;  %v450_v51 = vmov 0.0   ;;  %s451_s3 = smov [#allocation3]  }
   0xa   :  { %s368_s11 = sshll.u32 %s451_s3, 4  ;;  %s369_s11 = int_to_ptr.vmem [resolvable:$true] %s368_s11 }
   0xb   :  { %408 = vmatpush3.bf16.msra.mxu0 %v422_v6  ;;  %v342_v23 = vrot.slane %v397_v11, %v341_v20  ;;  %v349_v24 = vrot.slane %v335_v16, %v341_v20  ;;  %v181_v30 = vunpack.c.0.s8 %v180_v28  ;;  %v212_v43 = vunpack.c.0.s8 %v211_v32  ;;  %s423_s12 = scalar_lea.vmem %s369_s11, 576  ;;  %p428_p1 = scmp.lt.s32.totalorder %s369_s11, %s369_s11 }
   0xc   :  { %p424_p0 = scmp.ne.s32.totalorder %s369_s11, %s423_s12  ;;  %p429_p2 = scmp.lt.s32.totalorder %s423_s12, %s423_s12 }
   0xd   :  { %v353_v25 = vrot.slane %v342_v23, %v352_v21  ;;  %v357_v26 = vrot.slane %v349_v24, %v352_v21  ;;  %v184_v39 = vsub.s32 %v181_v30, %v183_v15  ;;  %v215_v55 = vsub.s32 %v212_v43, %v183_v15 }
   0xe   :  { %410 = vmatmul.mubr.msk.bf16.vlgmr.msra.gmra.mrb[0].mxu0 %vm112_vm0, %v80_v22  ;;  %p430_p3 = por %p429_p2, %p428_p1 }
   0xf   :  { %361 = vst [vmem:[#allocation3 + $0x20] sm:$0x3] %v353_v25  ;;  %362 = vst [vmem:[#allocation3 + $0x22] sm:$0x3] %v357_v26 }
  0x10   :  { %p431_p4 = pnand %p430_p3, %p424_p0 }
  0xe1   :  { %v411_v33 = vpop.f32.mrb[0].mxu0 }
  0xe2   :  { %v162_v34 = vadd.f32 %v411_v33, %v383_v29  ;;  %v153_v35 = vpop.f32.mrb[1].mxu0 }
  0xe3   :  { %v154_v37 = vadd.f32 %v383_v29, %v153_v35  ;;  %v412_v38 = vpop.f32.mrb[2].mxu0 }
  0xe4   :  { %v170_v40 = vmax.f32 %v162_v34, 0.0  ;;  %v165_v41 = vadd.f32 %v412_v38, %v383_v29  ;;  %v156_v42 = vpop.f32.mrb[3].mxu0 }
  0xe5   :  { %v168_v44 = vmax.f32 %v154_v37, 0.0  ;;  %v157_v46 = vadd.f32 %v383_v29, %v156_v42 }
  0xe6   :  { %v176_v47 = vadd.f32 %v172_v36, %v170_v40  ;;  %v171_v48 = vmax.f32 %v165_v41, 0.0 }
  0xe7   :  { %v174_v49 = vadd.f32 %v172_v36, %v168_v44  ;;  %v169_v50 = vmax.f32 %v157_v46, 0.0 }
  0xe8   :  { %v193_v52 = vcombine.high %v176_v47, %v450_v51  ;;  %v200_v53 = vrot.slane %v176_v47, %v184_v39  ;;  %v177_v54 = vadd.f32 %v173_v45, %v171_v48 }
  0xe9   :  { %v178_v56 = vcombine.high %v174_v49, %v450_v51  ;;  %v185_v57 = vrot.slane %v174_v49, %v184_v39  ;;  %v175_v58 = vadd.f32 %v173_v45, %v169_v50 }
  0xea   :  { %v207_v59 = vrot.slane %v193_v52, %v184_v39  ;;  %v259_v60 = vcombine.high %v177_v54, %v450_v51  ;;  %v266_v61 = vrot.slane %v177_v54, %v184_v39 }
  0xeb   :  { %v192_v62 = vrot.slane %v178_v56, %v184_v39  ;;  %v208_v63 = vcombine.low %v185_v57, %v200_v53  ;;  %v209_v0 = vcombine.high %v185_v57, %v200_v53  ;;  %v244_v1 = vcombine.high %v175_v58, %v450_v51 }
  0xec   :  { %v273_v2 = vrot.slane %v259_v60, %v184_v39  ;;  %v251_v3 = vrot.slane %v175_v58, %v184_v39 }
  0xed   :  { %v216_v4 = vrot.slane %v208_v63, %v215_v55  ;;  %v223_v5 = vrot.slane %v209_v0, %v215_v55  ;;  %v224_v6 = vcombine.low %v192_v62, %v207_v59  ;;  %v225_v7 = vcombine.high %v192_v62, %v207_v59  ;;  %389 = vst.sshfl [vmem:[#allocation3] sm:$0x11 pattern:$0x73516240] %v208_v63 }
  0xee   :  { %390 = vst.sshfl [vmem:[#allocation3 + $0x4] sm:$0x11 pattern:$0x73516240] %v209_v0  ;;  %v258_v8 = vrot.slane %v244_v1, %v184_v39  ;;  %v274_v9 = vcombine.low %v251_v3, %v266_v61  ;;  %v275_v10 = vcombine.high %v251_v3, %v266_v61 }
  0xef   :  { %v232_v11 = vrot.slane %v224_v6, %v215_v55  ;;  %v239_v12 = vrot.slane %v225_v7, %v215_v55  ;;  %v240_v13 = vcombine.high %v216_v4, %v450_v51  ;;  %v241_v14 = vcombine.high %v223_v5, %v450_v51  ;;  %391 = vst.sshfl [vmem:[#allocation3 + $0x8] sm:$0x11 pattern:$0x73516240] %v224_v6 }
  0xf0   :  { %392 = vst.sshfl [vmem:[#allocation3 + $0xc] sm:$0x11 pattern:$0x73516240] %v225_v7  ;;  %v282_v15 = vrot.slane %v274_v9, %v215_v55  ;;  %v289_v16 = vrot.slane %v275_v10, %v215_v55  ;;  %v290_v17 = vcombine.low %v258_v8, %v273_v2  ;;  %v291_v18 = vcombine.high %v258_v8, %v273_v2 }
  0xf1   :  { %393 = vst.sshfl [vmem:[#allocation3 + $0x10] sm:$0x11 pattern:$0x73516240] %v274_v9  ;;  %v242_v19 = vcombine.high %v232_v11, %v450_v51  ;;  %v243_v20 = vcombine.high %v239_v12, %v450_v51  ;;  %311 = vst [vmem:[#allocation3 + $0x2] sm:$0x3] %v240_v13 }
  0xf2   :  { %394 = vst.sshfl [vmem:[#allocation3 + $0x14] sm:$0x11 pattern:$0x73516240] %v275_v10  ;;  %313 = vst [vmem:[#allocation3 + $0x6] sm:$0x3] %v241_v14  ;;  %v298_v21 = vrot.slane %v290_v17, %v215_v55  ;;  %v305_v22 = vrot.slane %v291_v18, %v215_v55  ;;  %v306_v23 = vcombine.high %v282_v15, %v450_v51 }
  0xf3   :  { %v307_v24 = vcombine.high %v289_v16, %v450_v51  ;;  %395 = vst.sshfl [vmem:[#allocation3 + $0x18] sm:$0x11 pattern:$0x73516240] %v290_v17  ;;  %315 = vst [vmem:[#allocation3 + $0xa] sm:$0x3] %v242_v19 }
  0xf4   :  { %396 = vst.sshfl [vmem:[#allocation3 + $0x1c] sm:$0x11 pattern:$0x73516240] %v291_v18  ;;  %317 = vst [vmem:[#allocation3 + $0xe] sm:$0x3] %v243_v20  ;;  %v308_v25 = vcombine.high %v298_v21, %v450_v51  ;;  %v309_v26 = vcombine.high %v305_v22, %v450_v51 }
  0xf5   :  { %319 = vst [vmem:[#allocation3 + $0x12] sm:$0x3] %v306_v23  ;;  %321 = vst [vmem:[#allocation3 + $0x16] sm:$0x3] %v307_v24 }
  0xf6   :  { %323 = vst [vmem:[#allocation3 + $0x1a] sm:$0x3] %v308_v25  ;;  %325 = vst [vmem:[#allocation3 + $0x1e] sm:$0x3] %v309_v26 }
  0xf7   :  { %434 = shalt.err (!%p431_p4)
}
  0xf8   :  { %s435_s15 = scalar_lea.hbm %s536_s5, 576 }
  0xf9   :  { %p436_p5 = scmp.ne.s32.totalorder %s536_s5, %s435_s15  ;;  %p439_p6 = scmp.lt.u32.totalorder %s435_s15, %s536_s5 }
  0xfb   :  { %p441_p7 = pnand %p439_p6, %p436_p5 }
  0xfd   :  { %444 = shalt.err (!%p441_p7)
}
  0xfe   :  { %s452_s20 = smov 32   ;;  %s453_s21 = smov 2  }
  0xff   :  { %374 = dma.vmem_to_hbm [thread:$0]  %s369_s11, 576, %s536_s5, [#allocation4], %s452_s20, %s452_s20, %s453_s21  }
 0x100   :  { %445 = dma.done.wait [#allocation4], 576  }
 0x101   :  { %446 = vsyncadd [#allocation4], 4294966720 }
 0x102   :  { %378 = vsyncpa [#allocation4], 1 }

</bundles_post_ra>
